<compile_context>
chip_gen: v7x
topology: tpu7x:2x2x1
jax: 0.10.0
libtpu: 0.0.40
codegen_flags: <defaults>
</compile_context>

<pallas_src>
import jax
import jax.numpy as jnp
from jax.experimental import pallas as pl
from jax.experimental.pallas import tpu as pltpu

EPS = 1e-5


def _non_local_kernel(x_ref, p_ref, o_ref):
    # x_ref, o_ref: (C, N) f32 (batch dim squeezed out by pl.Squeezed()).
    # p_ref: (C+1, 5) f32 packed params:
    #   rows 0..C-1, cols 0..4 = [w_theta, w_phi, w_g, wW_eff, bW_eff] (per channel)
    #   row  C,      cols 0..2 = [b_theta, b_phi, b_g]
    C, N = x_ref.shape
    x = x_ref[...]                                               # (C, N)
    P = p_ref[...]                                               # (C+1, 5)

    wt = P[:C, 0:1]                                              # (C, 1)
    wp = P[:C, 1:2]
    wg = P[:C, 2:3]
    wW = P[:C, 3:4]                                              # W-conv weight * BN scale
    bW = P[:C, 4:5]                                              # fused W-conv bias + BN shift
    bt = P[C:C + 1, 0:1]                                         # (1, 1) projection biases
    bp = P[C:C + 1, 1:2]
    bg = P[C:C + 1, 2:3]

    # 1x1 convs (C -> 1): per-pixel channel reductions (sublane-axis sums, XLU; no MXU).
    theta = jnp.sum(x * wt, axis=0, keepdims=True) + bt          # (1, N)
    phi = jnp.sum(x * wp, axis=0, keepdims=True) + bp            # (1, N)
    g = jnp.sum(x * wg, axis=0, keepdims=True) + bg              # (1, N)

    # Rank-1 attention:  f = theta phi^T ; y = (f / N) g   ==>   y = theta * (phi . g) / N
    s = jnp.sum(phi * g, axis=1, keepdims=True) * (1.0 / N)      # (1, 1) scalar per batch
    y = theta * s                                                # (1, N)

    # W: 1x1 conv (1 -> C) with eval-mode BatchNorm folded in, plus the residual.
    o_ref[...] = (y * wW + bW + x).astype(o_ref.dtype)           # (C, N), lane-dense store


def non_local_pallas(x_nchw, params):
    B, C, H, W = x_nchw.shape
    N = H * W
    # Channel-first flatten: (B, C, H, W) -> (B, C, N). No transpose, no padding.
    x_flat = x_nchw.reshape(B, C, N).astype(jnp.float32)

    f32 = lambda a: jnp.asarray(a, jnp.float32)

    # Fold eval-mode BatchNorm (and the W-conv bias) into the W weights.
    scale = f32(params["bn_gamma"]) * jax.lax.rsqrt(f32(params["bn_var"]) + EPS)     # (C,)
    wW_eff = f32(params["w_W"]).reshape(-1) * scale                                  # (C,)
    bW_eff = (f32(params["b_W"]) - f32(params["bn_mean"])) * scale + f32(params["bn_beta"])

    # Pack all small parameters into one tiny VMEM operand.
    P = jnp.zeros((C + 1, 5), jnp.float32)
    P = P.at[:C, 0].set(f32(params["w_theta"]).reshape(-1))
    P = P.at[:C, 1].set(f32(params["w_phi"]).reshape(-1))
    P = P.at[:C, 2].set(f32(params["w_g"]).reshape(-1))
    P = P.at[:C, 3].set(wW_eff)
    P = P.at[:C, 4].set(bW_eff)
    P = P.at[C, 0].set(f32(params["b_theta"]).reshape(()))
    P = P.at[C, 1].set(f32(params["b_phi"]).reshape(()))
    P = P.at[C, 2].set(f32(params["b_g"]).reshape(()))

    z_flat = pl.pallas_call(
        _non_local_kernel,
        out_shape=jax.ShapeDtypeStruct((B, C, N), jnp.float32),
        grid_spec=pltpu.PrefetchScalarGridSpec(
            num_scalar_prefetch=0,
            grid=(B,),
            in_specs=[
                pl.BlockSpec((pl.Squeezed(), C, N), lambda b: (b, 0, 0)),   # x (per batch)
                pl.BlockSpec((C + 1, 5), lambda b: (0, 0)),                 # packed params (resident)
            ],
            out_specs=pl.BlockSpec((pl.Squeezed(), C, N), lambda b: (b, 0, 0)),
        ),
        compiler_params=pltpu.CompilerParams(dimension_semantics=("parallel",)),
    )(x_flat, P)

    return z_flat.reshape(B, C, H, W)


def non_local_ref(x_nchw, p):
    """Pure-JAX reference that mirrors the PyTorch forward exactly (eval-mode BN)."""
    B, C, H, W = x_nchw.shape
    N = H * W
    xf = x_nchw.reshape(B, C, N).transpose(0, 2, 1)                 # (B, N, C)
    g_x = xf @ p["w_g"] + p["b_g"]                                  # (B, N, 1)
    th = xf @ p["w_theta"] + p["b_theta"]
    ph = xf @ p["w_phi"] + p["b_phi"]
    f = jnp.einsum("bni,bmi->bnm", th, ph) / N                      # (B, N, N)
    y = f @ g_x                                                     # (B, N, 1)
    w_y = y @ p["w_W"] + p["b_W"]                                   # (B, N, C)
    w_y = (w_y - p["bn_mean"]) * jax.lax.rsqrt(p["bn_var"] + EPS) * p["bn_gamma"] + p["bn_beta"]
    z = w_y + xf
    return z.transpose(0, 2, 1).reshape(B, C, H, W)


if __name__ == "__main__":
    B, C, H, W = 2, 4, 16, 16        # in_channels = 4
    inter_channels = 2 // 2          # reduc_ratio // reduc_ratio == 1

    key = jax.random.PRNGKey(0)
    ks = jax.random.split(key, 10)
    x = jax.random.normal(ks[0], (B, C, H, W), jnp.float32)

    params = dict(
        # 1x1 conv weights stored as (in_c, out_c) matrices; biases as (out_c,)
        w_g=jax.random.normal(ks[1], (C, inter_channels), jnp.float32) * 0.2,
        b_g=jax.random.normal(ks[2], (inter_channels,), jnp.float32) * 0.1,
        w_theta=jax.random.normal(ks[3], (C, inter_channels), jnp.float32) * 0.2,
        b_theta=jax.random.normal(ks[4], (inter_channels,), jnp.float32) * 0.1,
        w_phi=jax.random.normal(ks[5], (C, inter_channels), jnp.float32) * 0.2,
        b_phi=jax.random.normal(ks[6], (inter_channels,), jnp.float32) * 0.1,
        w_W=jax.random.normal(ks[7], (inter_channels, C), jnp.float32) * 0.2,
        b_W=jax.random.normal(ks[8], (C,), jnp.float32) * 0.1,
        # nn.init.constant_(self.W[1].weight, 0.0); nn.init.constant_(self.W[1].bias, 0.0)
        bn_gamma=jnp.zeros((C,), jnp.float32),
        bn_beta=jnp.zeros((C,), jnp.float32),
        bn_mean=jnp.zeros((C,), jnp.float32),
        bn_var=jnp.ones((C,), jnp.float32),
    )

    # Faithful-init check (BN gamma=beta=0 => z == x).
    z = non_local_pallas(x, params)
    jax.block_until_ready(z)
    z_ref = non_local_ref(x, params)
    assert jnp.allclose(z, z_ref, atol=1e-3, rtol=1e-3), "mismatch vs reference (faithful init)"

    # Non-trivial BN check so the full non-local path + BN fold is exercised.
    params_chk = dict(
        params,
        bn_gamma=jnp.ones((C,), jnp.float32),
        bn_beta=jnp.full((C,), 0.3, jnp.float32),
        bn_mean=jnp.full((C,), 0.1, jnp.float32),
        bn_var=jnp.full((C,), 2.0, jnp.float32),
    )
    z2 = non_local_pallas(x, params_chk)
    jax.block_until_ready(z2)
    assert jnp.allclose(z2, non_local_ref(x, params_chk), atol=1e-3, rtol=1e-3), \
        "mismatch vs reference (non-trivial BN check)"

    print("KERNEL_OK")
</pallas_src>

<mosaic_0001>
module attributes {stable_mosaic.version = 11 : i64} {
  func.func @_non_local_kernel(%arg0: i32, %arg1: memref<1x4x256xf32, #tpu.memory_space<vmem>>, %arg2: memref<5x5xf32, #tpu.memory_space<vmem>>, %arg3: memref<1x4x256xf32, #tpu.memory_space<vmem>>) attributes {dimension_semantics = [#tpu.dimension_semantics<parallel>], iteration_bounds = array<i64: 2>, scalar_prefetch = 0 : i64, scratch_operands = 0 : i64, tpu.core_type = #tpu.core_type<tc>, window_params = [{transform_indices = @transform_0, window_bounds = array<i64: 1, 4, 256>}, {pipeline_mode = #tpu.pipeline_mode<synchronous>, transform_indices = @transform_1, window_bounds = array<i64: 5, 5>}, {transform_indices = @transform_2, window_bounds = array<i64: 1, 4, 256>}]} {
    %c0 = arith.constant 0 : index
    %c0_0 = arith.constant 0 : index
    %c0_1 = arith.constant 0 : index
    %0 = vector.load %arg1[%c0, %c0_0, %c0_1] : memref<1x4x256xf32, #tpu.memory_space<vmem>>, vector<1x4x256xf32>
    %1 = vector.shape_cast %0 : vector<1x4x256xf32> to vector<4x256xf32>
    %c0_2 = arith.constant 0 : index
    %c0_3 = arith.constant 0 : index
    %2 = vector.load %arg2[%c0_2, %c0_3] : memref<5x5xf32, #tpu.memory_space<vmem>>, vector<5x5xf32>
    %3 = vector.extract_strided_slice %2 {offsets = [0, 0], sizes = [4, 1], strides = [1, 1]} : vector<5x5xf32> to vector<4x1xf32>
    %4 = vector.extract_strided_slice %2 {offsets = [0, 1], sizes = [4, 1], strides = [1, 1]} : vector<5x5xf32> to vector<4x1xf32>
    %5 = vector.extract_strided_slice %2 {offsets = [0, 2], sizes = [4, 1], strides = [1, 1]} : vector<5x5xf32> to vector<4x1xf32>
    %6 = vector.extract_strided_slice %2 {offsets = [0, 3], sizes = [4, 1], strides = [1, 1]} : vector<5x5xf32> to vector<4x1xf32>
    %7 = vector.extract_strided_slice %2 {offsets = [0, 4], sizes = [4, 1], strides = [1, 1]} : vector<5x5xf32> to vector<4x1xf32>
    %8 = vector.extract_strided_slice %2 {offsets = [4, 0], sizes = [1, 1], strides = [1, 1]} : vector<5x5xf32> to vector<1x1xf32>
    %9 = vector.extract_strided_slice %2 {offsets = [4, 1], sizes = [1, 1], strides = [1, 1]} : vector<5x5xf32> to vector<1x1xf32>
    %10 = vector.extract_strided_slice %2 {offsets = [4, 2], sizes = [1, 1], strides = [1, 1]} : vector<5x5xf32> to vector<1x1xf32>
    %11 = vector.broadcast %3 : vector<4x1xf32> to vector<4x256xf32>
    %12 = arith.mulf %1, %11 : vector<4x256xf32>
    %cst = arith.constant dense<0.000000e+00> : vector<256xf32>
    %13 = vector.multi_reduction <add>, %12, %cst [0] : vector<4x256xf32> to vector<256xf32>
    %14 = vector.shape_cast %13 : vector<256xf32> to vector<1x256xf32>
    %15 = vector.broadcast %8 : vector<1x1xf32> to vector<1x256xf32>
    %16 = arith.addf %14, %15 : vector<1x256xf32>
    %17 = vector.broadcast %4 : vector<4x1xf32> to vector<4x256xf32>
    %18 = arith.mulf %1, %17 : vector<4x256xf32>
    %cst_4 = arith.constant dense<0.000000e+00> : vector<256xf32>
    %19 = vector.multi_reduction <add>, %18, %cst_4 [0] : vector<4x256xf32> to vector<256xf32>
    %20 = vector.shape_cast %19 : vector<256xf32> to vector<1x256xf32>
    %21 = vector.broadcast %9 : vector<1x1xf32> to vector<1x256xf32>
    %22 = arith.addf %20, %21 : vector<1x256xf32>
    %23 = vector.broadcast %5 : vector<4x1xf32> to vector<4x256xf32>
    %24 = arith.mulf %1, %23 : vector<4x256xf32>
    %cst_5 = arith.constant dense<0.000000e+00> : vector<256xf32>
    %25 = vector.multi_reduction <add>, %24, %cst_5 [0] : vector<4x256xf32> to vector<256xf32>
    %26 = vector.shape_cast %25 : vector<256xf32> to vector<1x256xf32>
    %27 = vector.broadcast %10 : vector<1x1xf32> to vector<1x256xf32>
    %28 = arith.addf %26, %27 : vector<1x256xf32>
    %29 = arith.mulf %22, %28 : vector<1x256xf32>
    %cst_6 = arith.constant dense<0.000000e+00> : vector<1xf32>
    %30 = vector.multi_reduction <add>, %29, %cst_6 [1] : vector<1x256xf32> to vector<1xf32>
    %31 = vector.shape_cast %30 : vector<1xf32> to vector<1x1xf32>
    %cst_7 = arith.constant 3.906250e-03 : f32
    %32 = vector.broadcast %cst_7 : f32 to vector<1x1xf32>
    %33 = arith.mulf %31, %32 : vector<1x1xf32>
    %34 = vector.broadcast %33 : vector<1x1xf32> to vector<1x256xf32>
    %35 = arith.mulf %16, %34 : vector<1x256xf32>
    %36 = vector.broadcast %35 : vector<1x256xf32> to vector<4x256xf32>
    %37 = vector.broadcast %6 : vector<4x1xf32> to vector<4x256xf32>
    %38 = arith.mulf %36, %37 : vector<4x256xf32>
    %39 = vector.broadcast %7 : vector<4x1xf32> to vector<4x256xf32>
    %40 = arith.addf %38, %39 : vector<4x256xf32>
    %41 = arith.addf %40, %1 : vector<4x256xf32>
    %c0_8 = arith.constant 0 : index
    %c0_9 = arith.constant 0 : index
    %c0_10 = arith.constant 0 : index
    %42 = vector.load %arg3[%c0_8, %c0_9, %c0_10] : memref<1x4x256xf32, #tpu.memory_space<vmem>>, vector<1x4x256xf32>
    %43 = vector.shape_cast %42 : vector<1x4x256xf32> to vector<4x256xf32>
    %44 = vector.shape_cast %41 : vector<4x256xf32> to vector<1x4x256xf32>
    tpu.vector_store %arg3[%c0_8, %c0_9, %c0_10], %44 {strides = array<i32>} : memref<1x4x256xf32, #tpu.memory_space<vmem>>, vector<1x4x256xf32>,
    return
  }
  func.func @transform_0(%arg0: i32) -> (i32, i32, i32) {
    %c0_i32 = arith.constant 0 : i32
    %c0_i32_0 = arith.constant 0 : i32
    %c0_i32_1 = arith.constant 0 : i32
    return %arg0, %c0_i32, %c0_i32_0 : i32, i32, i32
  }
  func.func @transform_1(%arg0: i32) -> (i32, i32) {
    %c0_i32 = arith.constant 0 : i32
    %c0_i32_0 = arith.constant 0 : i32
    %c0_i32_1 = arith.constant 0 : i32
    return %c0_i32, %c0_i32_0 : i32, i32
  }
  func.func @transform_2(%arg0: i32) -> (i32, i32, i32) {
    %c0_i32 = arith.constant 0 : i32
    %c0_i32_0 = arith.constant 0 : i32
    %c0_i32_1 = arith.constant 0 : i32
    return %arg0, %c0_i32, %c0_i32_0 : i32, i32, i32
  }
}

</mosaic_0001>

<bundles_post_ra>
// kernel: tpu_custom_call.1
= control target key start
LH: loop header
LB: loop body
LE: loop exit
PB: predicated region body
PF: predicated region fallthrough
CT: control target
= control target key end

     0   :  { %7 = vsyncpa [#allocation3], 0  ;;  %s878_s0 = inlined_call_operand.hbm [shape: f32[2,4,256], index: 0, kind: input, shape index: {}]   ;;  %s879_s1 = inlined_call_operand.hbm [shape: f32[5,5], index: 1, kind: input, shape index: {}]   ;;  %s880_s2 = inlined_call_operand.hbm [shape: f32[2,4,256], index: 2, kind: output, shape index: {}]  }
   0x1   :  { %9 = vsyncpa [#allocation3 + $0x1], 0 }
   0x2   :  { %10 = vsyncpa [#allocation6], 0 }
   0x3   :  { %11 = vsyncpa [#allocation4], 0 }
   0x4   :  { %13 = vsyncpa [#allocation4 + $0x1], 0  ;;  %s650_s9 = smov 0   ;;  %s652_s10 = smov 0  }
   0x5   :  { %s654_s11 = smov 0   ;;  %s656_s12 = smov 0  }
   0x6 LB: > { %s671_s13 = sadd.s32 4294967295, %s624_s12   ;;  %s409_s14 = sadd.s32 4294967294, %s624_s12   ;;  %s624_s12 = sphi %s656_s12, %s904_s12   ;;  %s620_s11 = sphi %s654_s11, %s903_s11   ;;  %s616_s10 = sphi %s652_s10, %s902_s10   ;;  %s612_s9 = sphi %s650_s9, %s901_s9  }
   0x7   : > { %p39_p0 = scmp.ne.s32.totalorder %s616_s10, %s612_s9  ;;  %p881_p1 = scmp.eq.s32.totalorder %s671_s13, 0 }
   0x8   : > { %p90_p3 = scmp.eq.s32.totalorder %s409_s14, 1  ;;  %p410_p5 = scmp.ge.s32.totalorder %s624_s12, 1 }
   0x9   : > { %p680_p4 = por %p881_p1, %p39_p0  ;;  %p97_p7 = scmp.lt.s32.totalorder %s624_s12, 3 }
   0xa   : > { %p685_p6 = por %p90_p3, %p39_p0  ;;  %s626_s18 = smov [#allocation5]  }
   0xb   : > { %s884_s15 = scalar_select %p680_p4, 1, 0 }
   0xc   : > { %s885_s16 = scalar_select %p685_p6, 1, 0 }
   0xd   : > { %p690_p8 = pnand %p410_p5, %p97_p7  ;;  %s110_s19 = sshll.u32 %s626_s18, 4  ;;  %s111_s19 = int_to_ptr.vmem [resolvable:$true] %s110_s19 }
   0xe   : > { %s698_s20 = sadd.s32 1, %s624_s12   ;;  %s26_s24 = sadd.s32 1, %s620_s11 }
   0xf   : > { %s886_s17 = scalar_select %p690_p8, 1, 0 }
  0x10   : > { %p435_p10 = pneg %p690_p8  ;;  %s23_s22 = ssub.s32 %s624_s12, %s698_s20 }
  0x11   : > { %p708_p12 = scmp.eq.s32.totalorder %s23_s22, 0  ;;  %s496_s27 = scalar_lea.hbm %s879_s1, 128 }
  0x12   : > { %p702_p11 = pnand %p435_p10, %p881_p1  ;;  %p497_p0 = scmp.ne.s32.totalorder %s879_s1, %s496_s27 }
  0x13   : > { %s888_s23 = scalar_select %p708_p12, 1, 0 }
  0x14   : > { %p498_p3 = pneg %p702_p11  ;;  %p503_p10 = scmp.lt.u32.totalorder %s496_s27, %s879_s1 }
  0x16   : > { %p499_p5 = pnand %p498_p3, %p497_p0 }
  0x18   : > { %p500_p7 = pneg %p499_p5 }
  0x1a   : > { %p505_p9 = pnand %p503_p10, %p500_p7 }
  0x1c   : > { %508 = shalt.err (!%p505_p9)
}
  0x1d   : > { %s509_s4 = scalar_lea.vmem %s111_s19, 128  ;;  %p517_p6 = scmp.lt.s32.totalorder %s111_s19, %s111_s19 }
  0x1e   : > { %p510_p1 = scmp.ne.s32.totalorder %s111_s19, %s509_s4  ;;  %p518_p4 = scmp.lt.s32.totalorder %s509_s4, %s509_s4 }
  0x20   : > { %p512_p2 = pnand %p510_p1, %p498_p3  ;;  %p519_p8 = por %p518_p4, %p517_p6 }
  0x22   : > { %p513_p13 = pneg %p512_p2 }
  0x24   : > { %p520_p12 = pnand %p519_p8, %p513_p13 }
  0x26   : > { %523 = shalt.err (!%p520_p12)
}
  0x27   : > { %438 = dma.hbm_to_vmem [thread:$0]  (!%p702_p11), %s879_s1, 128, %s111_s19, [#allocation6]  }
  0x28   : > { %p889_p1 = scmp.ne.s32.totalorder %s888_s23, 0  ;;  %p34_p2 = scmp.eq.s32.totalorder %s624_s12, 0 }
  0x29   : > { %p890_p4 = scmp.ne.s32.totalorder %s620_s11, %s616_s10  ;;  %p891_p6 = scmp.eq.s32.totalorder %s671_s13, 1 }
  0x2a   : > { %s734_s7 = scalar_select %p889_p1, %s620_s11, %s26_s24  }
  0x2b   : > { %p742_p8 = por %p891_p6, %p890_p4  ;;  %p448_p9 = scmp.lt.s32.totalorder %s624_s12, 2 }
  0x2c   : > { %s121_s14 = sand.u32 1, %s620_s11   ;;  %p893_p12 = pmov %p890_p4 }
  0x2d   : > { %s413_s18 = sshll.u32 %s121_s14, 3  ;;  %s425_s21 = sshll.u32 %s624_s12, 7 }
  0x2e   : > { %p35_p13 = por %p34_p2, %p893_p12  ;;  %s755_s19 = scalar_lea.hbm %s878_s0, %s425_s21 }
  0x2f   : > { %s125_s23 = scalar_lea.vmem [#allocation2], %s413_s18  ;;  %s122_s27 = scalar_lea.sflag [#allocation3], %s121_s14 }
  0x30   : > { %s133_s24 = sshll.u32 %s125_s23, 4  ;;  %p757_p11 = pnand %p448_p9, %p35_p13  ;;  %s761_s24 = int_to_ptr.vmem [resolvable:$true] %s133_s24 }
  0x31   : > { %s524_s28 = scalar_lea.hbm %s755_s19, 128  ;;  %s529_s3 = scalar_lea.hbm %s878_s0, 256 }
  0x32   : > { %p525_p0 = scmp.ne.s32.totalorder %s755_s19, %s524_s28  ;;  %p526_p3 = pneg %p757_p11 }
  0x33   : > { %p530_p10 = scmp.lt.u32.totalorder %s755_s19, %s878_s0  ;;  %p531_p1 = scmp.lt.u32.totalorder %s529_s3, %s524_s28 }
  0x34   : > { %p527_p5 = pnand %p526_p3, %p525_p0  ;;  %p533_p4 = scmp.lt.u32.totalorder %s524_s28, %s755_s19 }
  0x35   : > { %p532_p2 = por %p531_p1, %p530_p10 }
  0x36   : > { %p528_p7 = pneg %p527_p5 }
  0x37   : > { %p534_p6 = por %p533_p4, %p532_p2 }
  0x39   : > { %p535_p9 = pnand %p534_p6, %p528_p7 }
  0x3b   : > { %538 = shalt.err (!%p535_p9)
}
  0x3c   : > { %s539_s6 = scalar_lea.vmem %s761_s24, 128  ;;  %s627_s14 = smov [#allocation2]  }
  0x3d   : > { %p540_p12 = scmp.ne.s32.totalorder %s761_s24, %s539_s6  ;;  %s544_s18 = sshll.u32 %s627_s14, 4  ;;  %s545_s18 = int_to_ptr.vmem [resolvable:$false] %s544_s18 }
  0x3e   : > { %s546_s21 = scalar_lea.vmem %s545_s18, 256  ;;  %p547_p5 = scmp.lt.s32.totalorder %s761_s24, %s545_s18 }
  0x3f   : > { %p542_p13 = pnand %p540_p12, %p526_p3  ;;  %p548_p10 = scmp.lt.s32.totalorder %s546_s21, %s539_s6 }
  0x41   : > { %p543_p0 = pneg %p542_p13  ;;  %p549_p1 = por %p548_p10, %p547_p5 }
  0x43   : > { %p550_p2 = pnand %p549_p1, %p543_p0 }
  0x45   : > { %553 = shalt.err (!%p550_p2)
}
  0x46   : > { %442 = dma.hbm_to_vmem [thread:$0]  (!%p757_p11), %s755_s19, 128, %s761_s24, %s122_s27  }
  0x47   : > { %p895_p7 = scmp.ne.s32.totalorder %s886_s17, 0 }
  0x48   : > { %s791_s22 = sand.u32 (!%p895_p7), 1, %s616_s10   ;;  %p896_p3 = scmp.ne.s32.totalorder (!%p895_p7), %s884_s15, 0 }
  0x49   : > { %142 = sbr.rel (%p895_p7) target bundleno = 415 (0x19f), region = 28  ;;  %s417_s25 = sshll.u32 (!%p895_p7), %s791_s22, 3 }
  0x4a   : > { %s145_s23 = scalar_lea.sflag (!%p895_p7), [#allocation3], %s791_s22  ;;  %s148_s28 = scalar_lea.vmem (!%p895_p7), [#allocation2], %s417_s25 }
  0x50   : > { %599 = dma.done.wait (%p896_p3), %s145_s23, 128  }
  0x51   : > { %601 = vsyncadd (%p896_p3), %s145_s23, 4294967168  ;;  %p897_p11 = scmp.eq.s32.totalorder %s671_s13, 0 }
  0x53   : > { %603 = dma.done.wait (%p897_p11), [#allocation6], 128   ;;  %p898_p4 = pmov %p897_p11 }
  0x54   : > { %v628_v0 = vmov 1   ;;  %v629_v1 = vmov 0   ;;  %v174_v2 = vld [vmem:[#allocation5] sm:$0x1f]  ;;  %v630_v3 = vmov 2   ;;  %v631_v4 = vmov 3  }
  0x55   : > { %605 = vsyncadd (%p898_p4), [#allocation6], 4294967168  ;;  %490 = vset.pattern.permute.xlu0 %v628_v0  ;;  %492 = vset.pattern.permute.xlu1 %v629_v1  ;;  %v632_v5 = vmov 4   ;;  %v633_v6 = vmov 839922192   ;;  %v182_v8 = vlaneseq  ;;  %v808_v13 = vld [vmem:[%s148_s28] sm:$0xff] }
  0x56   : > { %210 = vperm.xlu0 %490, %v174_v2   ;;  %177 = vperm.xlu1 %492, %v174_v2   ;;  %v180_v7 = vunpack.c.l.s4 %v633_v6  ;;  %vm191_vm0 = vcmask 1043456   ;;  %vm275_vm1 = vcmask 1044484   ;;  %s426_s15 = sshll.u32 %s671_s13, 7  ;;  %s172_s17 = scalar_lea.vmem [#allocation7], %s417_s25 }
  0x57   : > { %v805_v10 = vshrl.u32 %v182_v8, 7  ;;  %s329_s19 = sshll.u32 %s172_s17, 4  ;;  %s834_s27 = scalar_lea.hbm %s880_s2, %s426_s15  ;;  %s836_s19 = int_to_ptr.vmem [resolvable:$true] %s329_s19 }
  0x58   : > { %v181_v9 = vunpack.c.0.s8 %v180_v7  ;;  %s315_s29 = scalar_lea.sflag [#allocation4], %s791_s22  ;;  %s554_s13 = scalar_lea.vmem %s836_s19, 128 }
  0x59   : > { %p555_p6 = scmp.ne.s32.totalorder %s836_s19, %s554_s13  ;;  %s634_s30 = smov [#allocation7]  }
  0x5a   : > { %491 = vset.pattern.permute.xlu0 %v630_v3  ;;  %v184_v11 = vsub.s32 %v181_v9, %v805_v10  ;;  %s558_s3 = sshll.u32 %s634_s30, 4  ;;  %s559_s3 = int_to_ptr.vmem [resolvable:$false] %s558_s3 }
  0x5b   : > { %242 = vperm.xlu0 %491, %v174_v2   ;;  %p556_p9 = pnand %p555_p6, %p742_p8  ;;  %s560_s4 = scalar_lea.vmem %s559_s3, 256 }
  0x5c   : > { %p561_p13 = scmp.lt.s32.totalorder %s836_s19, %s559_s3  ;;  %p562_p0 = scmp.lt.s32.totalorder %s560_s4, %s554_s13 }
  0x5d   : > { %p557_p12 = pneg %p556_p9 }
  0x5e   : > { %p563_p5 = por %p562_p0, %p561_p13 }
  0x5f   : > { %493 = vset.pattern.permute.xlu0 %v631_v4 }
  0x60   : > { %293 = vperm.xlu0 %493, %v174_v2   ;;  %p564_p10 = pnand %p563_p5, %p557_p12 }
  0x64   : > { %494 = vset.pattern.permute.xlu0 %v632_v5 }
  0x65   : > { %299 = vperm.xlu0 %494, %v174_v2  }
  0xd5   : > { %v211_v12 = vpop.permute.xlu0 %210  ;;  %v810_v14 = vpop.permute.xlu1 %177 }
  0xd6   : > { %v218_v15 = vrot.slane %v211_v12, %v184_v11  ;;  %v185_v16 = vrot.slane %v810_v14, %v184_v11 }
  0xd8   : > { %v220_v17 = vmul.f32 %v218_v15, %v808_v13  ;;  %v187_v18 = vmul.f32 %v185_v16, %v808_v13 }
  0xda   : > { %v222_v19 = vcombine.high %v220_v17, %v220_v17  ;;  %v224_v20 = vsel %vm191_vm0, %v220_v17, 0.0  ;;  %v243_v21 = vpop.permute.xlu0 %242  ;;  %v189_v22 = vcombine.high %v187_v18, %v187_v18  ;;  %v192_v23 = vsel %vm191_vm0, %v187_v18, 0.0 }
  0xdb   : > { %v225_v24 = vrot.slane %v224_v20, 4  ;;  %v250_v25 = vrot.slane %v243_v21, %v184_v11  ;;  %v193_v0 = vrot.slane %v192_v23, 4 }
  0xdc   : > { %v231_v26 = vsel %vm191_vm0, %v222_v19, 0.0  ;;  %v199_v27 = vsel %vm191_vm0, %v189_v22, 0.0 }
  0xdd   : > { %v226_v28 = vadd.f32 %v225_v24, %v224_v20  ;;  %v232_v29 = vrot.slane %v231_v26, 4  ;;  %v252_v30 = vmul.f32 %v250_v25, %v808_v13  ;;  %v200_v1 = vrot.slane %v199_v27, 4 }
  0xde   : > { %v194_v2 = vadd.f32 %v193_v0, %v192_v23  ;;  %v286_v20 = vsub.s32 4, %v805_v10 }
  0xdf   : > { %v227_v31 = vrot.slane %v226_v28, 2  ;;  %v233_v32 = vadd.f32 %v232_v29, %v231_v26  ;;  %v254_v33 = vcombine.high %v252_v30, %v252_v30  ;;  %v256_v34 = vsel %vm191_vm0, %v252_v30, 0.0  ;;  %v294_v16 = vpop.permute.xlu0 %293 }
  0xe0   : > { %v257_v35 = vrot.slane %v256_v34, 4  ;;  %v201_v3 = vadd.f32 %v200_v1, %v199_v27  ;;  %v195_v4 = vrot.slane %v194_v2, 2 }
  0xe1   : > { %v228_v36 = vadd.f32 %v227_v31, %v226_v28  ;;  %v234_v37 = vrot.slane %v233_v32, 2  ;;  %v263_v38 = vsel %vm191_vm0, %v254_v33, 0.0  ;;  %v305_v28 = vcombine.high %v808_v13, %v808_v13 }
  0xe2   : > { %v258_v39 = vadd.f32 %v257_v35, %v256_v34  ;;  %v264_v40 = vrot.slane %v263_v38, 4  ;;  %v202_v5 = vrot.slane %v201_v3, 2  ;;  %v196_v6 = vadd.f32 %v195_v4, %v194_v2 }
  0xe3   : > { %v235_v41 = vadd.f32 %v234_v37, %v233_v32  ;;  %v229_v42 = vrot.slane %v228_v36, 1 }
  0xe4   : > { %v259_v43 = vrot.slane %v258_v39, 2  ;;  %v265_v44 = vadd.f32 %v264_v40, %v263_v38  ;;  %v203_v7 = vadd.f32 %v202_v5, %v201_v3  ;;  %v197_v8 = vrot.slane %v196_v6, 1  ;;  %v300_v25 = vpop.permute.xlu0 %299 }
  0xe5   : > { %v236_v45 = vrot.slane %v235_v41, 1  ;;  %v230_v48 = vadd.f32 %v229_v42, %v228_v36 }
  0xe6   : > { %v260_v46 = vadd.f32 %v259_v43, %v258_v39  ;;  %v266_v47 = vrot.slane %v265_v44, 2  ;;  %v204_v9 = vrot.slane %v203_v7, 1  ;;  %v198_v11 = vadd.f32 %v197_v8, %v196_v6 }
  0xe7   : > { %v237_v51 = vadd.f32 %v236_v45, %v235_v41  ;;  %v239_v54 = vadd.f32 %v230_v48, %v211_v12 }
  0xe8   : > { %v261_v49 = vrot.slane %v260_v46, 1  ;;  %v267_v50 = vadd.f32 %v266_v47, %v265_v44  ;;  %v207_v17 = vadd.f32 %v198_v11, %v810_v14 }
  0xe9   : > { %v240_v57 = vadd.f32 %v237_v51, %v211_v12  ;;  %v205_v12 = vadd.f32 %v204_v9, %v203_v7 }
  0xea   : > { %v262_v52 = vadd.f32 %v261_v49, %v260_v46  ;;  %v268_v53 = vrot.slane %v267_v50, 1 }
  0xeb   : > { %v208_v18 = vadd.f32 %v205_v12, %v810_v14 }
  0xec   : > { %v269_v55 = vadd.f32 %v268_v53, %v267_v50  ;;  %v271_v56 = vadd.f32 %v262_v52, %v243_v21 }
  0xee   : > { %v272_v58 = vadd.f32 %v269_v55, %v243_v21  ;;  %v273_v59 = vmul.f32 %v271_v56, %v239_v54 }
  0xf0   : > { %v274_v60 = vmul.f32 %v272_v58, %v240_v57  ;;  %v276_v61 = vsel %vm275_vm1, %v273_v59, 0.0 }
  0xf2   : > { %v277_v62 = vsel %vm275_vm1, %v274_v60, 0.0 }
  0xf3   : > { %v278_v63 = vadd.f32 %v277_v62, %v276_v61 }
  0xf5   : > { %279 = vadd.xlane.f32.xlu1 %v278_v63 }
 0x182   : > { %v280_v15 = vpop.xlane.xlu1 %279 }
 0x183   : > { %v281_v19 = vmul.f32 0.00390625, %v280_v15 }
 0x185   : > { %v282_v21 = vmul.f32 %v281_v19, %v207_v17  ;;  %v283_v22 = vmul.f32 %v281_v19, %v208_v18 }
 0x187   : > { %v287_v23 = vrot.slane %v282_v21, %v286_v20  ;;  %v291_v24 = vrot.slane %v283_v22, %v286_v20 }
 0x189   : > { %v296_v26 = vmul.f32 %v294_v16, %v287_v23  ;;  %v297_v27 = vmul.f32 %v294_v16, %v291_v24 }
 0x18b   : > { %v302_v29 = vadd.f32 %v300_v25, %v296_v26  ;;  %v303_v30 = vadd.f32 %v300_v25, %v297_v27 }
 0x18d   : > { %v307_v10 = vadd.f32 %v302_v29, %v808_v13  ;;  %v308_v14 = vadd.f32 %v305_v28, %v303_v30 }
 0x18f   : > { %v311_v31 = vcombine.low %v307_v10, %v308_v14 }
 0x191   : > { %313 = vst [vmem:[%s172_s17] sm:$0xff] %v311_v31 }
 0x192   : > { %567 = shalt.err (!%p564_p10)
}
 0x193   : > { %s568_s5 = scalar_lea.hbm %s834_s27, 128  ;;  %s572_s18 = scalar_lea.hbm %s880_s2, 256 }
 0x194   : > { %p569_p1 = scmp.ne.s32.totalorder %s834_s27, %s568_s5  ;;  %p573_p3 = scmp.lt.u32.totalorder %s834_s27, %s880_s2 }
 0x195   : > { %p574_p11 = scmp.lt.u32.totalorder %s572_s18, %s568_s5  ;;  %p576_p6 = scmp.lt.u32.totalorder %s568_s5, %s834_s27 }
 0x196   : > { %p570_p2 = pnand %p569_p1, %p742_p8 }
 0x197   : > { %p575_p4 = por %p574_p11, %p573_p3 }
 0x198   : > { %p571_p7 = pneg %p570_p2 }
 0x199   : > { %p577_p9 = por %p576_p6, %p575_p4 }
 0x19b   : > { %p578_p12 = pnand %p577_p9, %p571_p7 }
 0x19d   : > { %581 = shalt.err (!%p578_p12)
}
 0x19e   : > { %433 = dma.vmem_to_hbm [thread:$0]  (%p742_p8), %s836_s19, 128, %s834_s27, %s315_s29  }
 0x19f PF: > { %s341_s25 = sand.u32 1, %s612_s9   ;;  %p899_p13 = scmp.ne.s32.totalorder %s885_s16, 0 }
 0x1a0   : > { %p900_p0 = scmp.ge.s32.totalorder %s624_s12, 2  ;;  %s342_s23 = scalar_lea.sflag [#allocation4], %s341_s25 }
 0x1a2   : > { %p444_p5 = pnand %p900_p0, %p899_p13 }
 0x1a4   : > { %607 = dma.done.wait (!%p444_p5), %s342_s23, 128  }
 0x1a5   : > { %609 = vsyncadd (!%p444_p5), %s342_s23, 4294967168  ;;  %p16_p10 = scmp.ge.s32.totalorder %s698_s20, 4   ;;  %s901_s9 = smov %s616_s10 }
 0x1a6   : > { %s902_s10 = smov %s620_s11  ;;  %s903_s11 = smov %s734_s7 }
 0x1a7   : > { %s904_s12 = smov %s698_s20  ;;  %18 = sbr.rel (!%p16_p10) target bundleno = 6 (0x6), region = 77 }
 0x1ae   :  { %347 = vsyncpa [#allocation3], 1 }
 0x1af   :  { %349 = vsyncpa [#allocation3 + $0x1], 1 }
 0x1b0   :  { %350 = vsyncpa [#allocation6], 1 }
 0x1b1   :  { %351 = vsyncpa [#allocation4], 1 }
 0x1b2   :  { %353 = vsyncpa [#allocation4 + $0x1], 1 }

</bundles_post_ra>
